<compile_context>
chip_gen: v6e
topology: v6e:2x2x1
jax: 0.10.0
libtpu: 0.0.40
codegen_flags: <defaults>
</compile_context>

<pallas_src>
import jax
import jax.numpy as jnp
from jax.experimental import pallas as pl
from jax.experimental.pallas import tpu as pltpu


# ---- Single-vreg slab layout: rows 0-3, lanes 0-21 of an (8, 128) f32 tile --
_L_W1 = 0    # lanes  0-1 : W1                    (4, 2)
_L_B1 = 2    # lane   2   : b1 as column          (4, 1)
_L_W2T = 4   # lanes  4-12: W2^T rows 0/1/2, each sublane-broadcast to (4, 3)
_L_B2 = 13   # lanes 13-15: b2, sublane-broadcast to (4, 3)
_L_XT = 16   # lanes 16-21: x^T rows 0/1, each sublane-broadcast to (4, 3)


def model_kernel(p_ref, out_ref):
    # Static ref slices are zero-cost views -> each operand is one offset vld.
    w1c0 = p_ref[0:4, _L_W1 + 0:_L_W1 + 1]      # (4, 1)  W1[:, 0]
    w1c1 = p_ref[0:4, _L_W1 + 1:_L_W1 + 2]      # (4, 1)  W1[:, 1]
    b1c = p_ref[0:4, _L_B1:_L_B1 + 1]           # (4, 1)  b1 as column
    w2r0 = p_ref[0:4, _L_W2T + 0:_L_W2T + 3]    # (4, 3)  W2^T row 0 (pre-bcast)
    w2r1 = p_ref[0:4, _L_W2T + 3:_L_W2T + 6]    # (4, 3)  W2^T row 1
    w2r2 = p_ref[0:4, _L_W2T + 6:_L_W2T + 9]    # (4, 3)  W2^T row 2
    b2b = p_ref[0:4, _L_B2:_L_B2 + 3]           # (4, 3)  b2 (pre-bcast)
    xt0 = p_ref[0:4, _L_XT + 0:_L_XT + 3]       # (4, 3)  x^T row 0 (pre-bcast)
    xt1 = p_ref[0:4, _L_XT + 3:_L_XT + 6]       # (4, 3)  x^T row 1

    # Linear(2, 4) fused with transpose(0, 1):
    #   t = W1 @ x^T + b1[:, None]  -> (4, 3)   (K = 2 unrolled on the VPU)
    t = w1c0 * xt0 + w1c1 * xt1 + b1c

    # stack([t, t, t], dim=1) then abs: the three copies are identical, so
    # abs(stack) == stack(abs(t)); compute abs once.
    a = jnp.abs(t)                              # (4, 3)

    # Linear(3, 3): o = a @ W2^T + b2  -> (4, 3)   (K = 3 unrolled on the VPU)
    o = a[:, 0:1] * w2r0 + a[:, 1:2] * w2r1 + a[:, 2:3] * w2r2 + b2b

    # Lane-dense (8, 128) output tile: full-tile writeback, no sub-tile store.
    out_ref[...] = jnp.zeros_like(out_ref)
    out_ref[0:4, 0:3] = o


def pack_weights(w1, b1, w2, b2):
    """Build the loop-invariant weight portion of the slab ONCE at init."""
    assert w1.shape == (4, 2) and b1.shape == (4,), (w1.shape, b1.shape)
    assert w2.shape == (3, 3) and b2.shape == (3,), (w2.shape, b2.shape)
    slab = jnp.zeros((8, 128), jnp.float32)
    slab = slab.at[0:4, _L_W1:_L_W1 + 2].set(w1.astype(jnp.float32))
    slab = slab.at[0:4, _L_B1:_L_B1 + 1].set(b1.reshape(4, 1).astype(jnp.float32))
    w2T = w2.T.astype(jnp.float32)                               # (3, 3)
    # W2^T rows, each sublane-broadcast to (4, 3), concatenated along lanes.
    slab = slab.at[0:4, _L_W2T:_L_W2T + 9].set(
        jnp.broadcast_to(w2T[None], (4, 3, 3)).reshape(4, 9))
    slab = slab.at[0:4, _L_B2:_L_B2 + 3].set(
        jnp.broadcast_to(b2.reshape(1, 3).astype(jnp.float32), (4, 3)))
    return slab


@jax.jit
def model_forward(x, weight_slab):
    # The reference chain is only shape-consistent for x of shape (3, 2).
    assert x.shape == (3, 2), x.shape

    # Per-call packing: x^T rows, sublane-broadcast to (4, 3) each, inserted
    # as one contiguous (4, 6) block with a single dynamic_update_slice.
    xT = x.T.astype(jnp.float32)                                 # (2, 3)
    xblk = jnp.broadcast_to(xT[None], (4, 2, 3)).reshape(4, 6)   # (4, 6)
    slab = jax.lax.dynamic_update_slice(weight_slab, xblk, (0, _L_XT))

    o_pad = pl.pallas_call(
        model_kernel,
        out_shape=jax.ShapeDtypeStruct((8, 128), jnp.float32),
        in_specs=[pl.BlockSpec(memory_space=pltpu.MemorySpace.VMEM)],
        out_specs=pl.BlockSpec(memory_space=pltpu.MemorySpace.VMEM),
    )(slab)

    o = o_pad[0:4, 0:3]
    # The Linear(3,3) output is identical for each of the 3 stacked copies, so
    # the full (4, 3, 3) result is a broadcast done by XLA inside the same jit.
    return jnp.broadcast_to(o[:, None, :], (4, 3, 3))


def _reference(x, w1, b1, w2, b2):
    # Pure-JAX mirror of the (repaired) PyTorch forward, for a sanity check.
    h = x @ w1.T + b1              # Linear(2, 4)        -> (N, 4)
    h = h.T                        # transpose(0, 1)     -> (4, N)
    s = jnp.stack([h, h, h], 1)    # stack dim=1         -> (4, 3, N)
    s = jnp.abs(s)
    return s @ w2.T + b2           # Linear(3, 3)        -> (4, 3, 3)


if __name__ == "__main__":
    key = jax.random.PRNGKey(0)
    kx, k1, k2, k3, k4 = jax.random.split(key, 5)

    # Input: (3, 2) — last dim 2 matches Linear(2, 4); leading dim 3 matches
    # the in-features of Linear(3, 3) after the transpose/stack.
    x = jax.random.normal(kx, (3, 2), dtype=jnp.float32)

    # Deterministic torch.nn.Linear-style init: U(-1/sqrt(fan_in), +1/sqrt(fan_in)).
    bound1 = 1.0 / jnp.sqrt(2.0)
    w1 = jax.random.uniform(k1, (4, 2), minval=-bound1, maxval=bound1,
                            dtype=jnp.float32)
    b1 = jax.random.uniform(k2, (4,), minval=-bound1, maxval=bound1,
                            dtype=jnp.float32)
    bound2 = 1.0 / jnp.sqrt(3.0)
    w2 = jax.random.uniform(k3, (3, 3), minval=-bound2, maxval=bound2,
                            dtype=jnp.float32)
    b2 = jax.random.uniform(k4, (3,), minval=-bound2, maxval=bound2,
                            dtype=jnp.float32)

    # Init-time (loop-invariant) weight packing, cached on device.
    weight_slab = jax.block_until_ready(pack_weights(w1, b1, w2, b2))

    out = model_forward(x, weight_slab)
    jax.block_until_ready(out)

    ref = _reference(x, w1, b1, w2, b2)
    assert out.shape == (4, 3, 3), out.shape
    assert jnp.allclose(out, ref, atol=1e-5, rtol=1e-5), "mismatch vs reference"

    print("KERNEL_OK")
</pallas_src>

<mosaic_0001>
module attributes {stable_mosaic.version = 11 : i64} {
  func.func @model_kernel(%arg0: memref<8x128xf32, #tpu.memory_space<vmem>>, %arg1: memref<8x128xf32, #tpu.memory_space<vmem>>) attributes {dimension_semantics = [], scalar_prefetch = 0 : i64, scratch_operands = 0 : i64, tpu.core_type = #tpu.core_type<tc>} {
    %c0 = arith.constant 0 : index
    %c0_0 = arith.constant 0 : index
    %0 = vector.load %arg0[%c0, %c0_0] : memref<8x128xf32, #tpu.memory_space<vmem>>, vector<4x1xf32>
    %c0_1 = arith.constant 0 : index
    %c1 = arith.constant 1 : index
    %1 = vector.load %arg0[%c0_1, %c1] : memref<8x128xf32, #tpu.memory_space<vmem>>, vector<4x1xf32>
    %c0_2 = arith.constant 0 : index
    %c2 = arith.constant 2 : index
    %2 = vector.load %arg0[%c0_2, %c2] : memref<8x128xf32, #tpu.memory_space<vmem>>, vector<4x1xf32>
    %c0_3 = arith.constant 0 : index
    %c4 = arith.constant 4 : index
    %3 = vector.load %arg0[%c0_3, %c4] : memref<8x128xf32, #tpu.memory_space<vmem>>, vector<4x3xf32>
    %c0_4 = arith.constant 0 : index
    %c7 = arith.constant 7 : index
    %4 = vector.load %arg0[%c0_4, %c7] : memref<8x128xf32, #tpu.memory_space<vmem>>, vector<4x3xf32>
    %c0_5 = arith.constant 0 : index
    %c10 = arith.constant 10 : index
    %5 = vector.load %arg0[%c0_5, %c10] : memref<8x128xf32, #tpu.memory_space<vmem>>, vector<4x3xf32>
    %c0_6 = arith.constant 0 : index
    %c13 = arith.constant 13 : index
    %6 = vector.load %arg0[%c0_6, %c13] : memref<8x128xf32, #tpu.memory_space<vmem>>, vector<4x3xf32>
    %c0_7 = arith.constant 0 : index
    %c16 = arith.constant 16 : index
    %7 = vector.load %arg0[%c0_7, %c16] : memref<8x128xf32, #tpu.memory_space<vmem>>, vector<4x3xf32>
    %c0_8 = arith.constant 0 : index
    %c19 = arith.constant 19 : index
    %8 = vector.load %arg0[%c0_8, %c19] : memref<8x128xf32, #tpu.memory_space<vmem>>, vector<4x3xf32>
    %9 = vector.broadcast %0 : vector<4x1xf32> to vector<4x3xf32>
    %10 = arith.mulf %9, %7 : vector<4x3xf32>
    %11 = vector.broadcast %1 : vector<4x1xf32> to vector<4x3xf32>
    %12 = arith.mulf %11, %8 : vector<4x3xf32>
    %13 = arith.addf %10, %12 : vector<4x3xf32>
    %14 = vector.broadcast %2 : vector<4x1xf32> to vector<4x3xf32>
    %15 = arith.addf %13, %14 : vector<4x3xf32>
    %16 = math.absf %15 : vector<4x3xf32>
    %17 = vector.extract_strided_slice %16 {offsets = [0, 0], sizes = [4, 1], strides = [1, 1]} : vector<4x3xf32> to vector<4x1xf32>
    %18 = vector.broadcast %17 : vector<4x1xf32> to vector<4x3xf32>
    %19 = arith.mulf %18, %3 : vector<4x3xf32>
    %20 = vector.extract_strided_slice %16 {offsets = [0, 1], sizes = [4, 1], strides = [1, 1]} : vector<4x3xf32> to vector<4x1xf32>
    %21 = vector.broadcast %20 : vector<4x1xf32> to vector<4x3xf32>
    %22 = arith.mulf %21, %4 : vector<4x3xf32>
    %23 = arith.addf %19, %22 : vector<4x3xf32>
    %24 = vector.extract_strided_slice %16 {offsets = [0, 2], sizes = [4, 1], strides = [1, 1]} : vector<4x3xf32> to vector<4x1xf32>
    %25 = vector.broadcast %24 : vector<4x1xf32> to vector<4x3xf32>
    %26 = arith.mulf %25, %5 : vector<4x3xf32>
    %27 = arith.addf %23, %26 : vector<4x3xf32>
    %28 = arith.addf %27, %6 : vector<4x3xf32>
    %cst = arith.constant 0.000000e+00 : f32
    %29 = vector.broadcast %cst : f32 to vector<8x128xf32>
    %c0_9 = arith.constant 0 : index
    %c0_10 = arith.constant 0 : index
    %30 = vector.load %arg1[%c0_9, %c0_10] : memref<8x128xf32, #tpu.memory_space<vmem>>, vector<8x128xf32>
    tpu.vector_store %arg1[%c0_9, %c0_10], %29 {strides = array<i32>} : memref<8x128xf32, #tpu.memory_space<vmem>>, vector<8x128xf32>,
    %c0_11 = arith.constant 0 : index
    %c0_12 = arith.constant 0 : index
    %31 = vector.load %arg1[%c0_11, %c0_12] : memref<8x128xf32, #tpu.memory_space<vmem>>, vector<4x3xf32>
    tpu.vector_store %arg1[%c0_11, %c0_12], %28 {strides = array<i32>} : memref<8x128xf32, #tpu.memory_space<vmem>>, vector<4x3xf32>,
    return
  }
}

</mosaic_0001>

<bundles_post_ra>
// kernel: model_forward.1
= control target key start
LH: loop header
LB: loop body
LE: loop exit
PB: predicated region body
PF: predicated region fallthrough
CT: control target
= control target key end

     0   :  { %v89_v0 = vmov 1   ;;  %v90_v2 = vmov 2   ;;  %v91_v3 = vmov 0   ;;  %v92_v4 = vmov 17   ;;  %s94_s8 = smov 125   ;;  %s97_s10 = smov 122   ;;  %s119_s0 = inlined_call_operand.vmem [shape: f32[8,128], index: 0, kind: input, shape index: {}]   ;;  %s120_s1 = inlined_call_operand.vmem [shape: f32[8,128], index: 1, kind: output, shape index: {}]  }
   0x1   :  { %83 = vset.pattern.permute.xlu0 %v89_v0  ;;  %v8_v1 = vld [vmem:[%s119_s0] sm:$0xf]  ;;  %85 = vset.pattern.permute.xlu1 %v90_v2  ;;  %v93_v5 = vmov 18   ;;  %v95_v15 = vmov 16   ;;  %v96_v16 = vmov 0.0   ;;  %s98_s11 = smov 119  }
   0x2   :  { %16 = vperm.xlu0 %83, %v8_v1   ;;  %26 = vperm.xlu1 %85, %v8_v1   ;;  %61 = vst [vmem:[%s120_s1] sm:$0xff] %v96_v16  ;;  %s99_s12 = smov 124   ;;  %vm66_vm0 = vcmask 19456  }
   0x6   :  { %84 = vset.pattern.permute.xlu0 %v91_v3  ;;  %86 = vset.pattern.permute.xlu1 %v92_v4 }
   0x7   :  { %11 = vperm.xlu0 %84, %v8_v1  }
   0xb   :  { %87 = vset.pattern.permute.xlu0 %v93_v5 }
  0x7d   :  { %v17_v6 = vpop.permute.xlu0 %16  ;;  %v27_v8 = vpop.permute.xlu1 %26 }
  0x7e   :  { %v19_v7 = vmul.f32 %v17_v6, %v8_v1 }
  0x80   :  { %21 = vrot.lane.b32.xlu1 %v19_v7, %s94_s8 }
  0x82   :  { %v12_v9 = vpop.permute.xlu0 %11 }
  0x83   :  { %v14_v10 = vmul.f32 %v12_v9, %v8_v1 }
  0xf2   :  { %v22_v11 = vpop.permute.xlu1 %21 }
  0xf3   :  { %v24_v12 = vadd.f32 %v22_v11, %v14_v10 }
  0xf5   :  { %v29_v13 = vadd.f32 %v27_v8, %v24_v12 }
  0xf7   :  { %v30_v14 = vand.u32 2147483647, %v29_v13 }
  0xf9   :  { %48 = vperm.xlu0 %87, %v30_v14   ;;  %38 = vperm.xlu1 %86, %v30_v14  }
  0xfd   :  { %88 = vset.pattern.permute.xlu1 %v95_v15 }
  0xfe   :  { %33 = vperm.xlu1 %88, %v30_v14  }
 0x174   :  { %v49_v17 = vpop.permute.xlu0 %48  ;;  %v39_v18 = vpop.permute.xlu1 %38 }
 0x175   :  { %v51_v19 = vmul.f32 %v49_v17, %v8_v1  ;;  %v41_v20 = vmul.f32 %v39_v18, %v8_v1 }
 0x177   :  { %53 = vrot.lane.b32.xlu0 %v51_v19, %s97_s10  ;;  %43 = vrot.lane.b32.xlu1 %v41_v20, %s94_s8 }
 0x179   :  { %v34_v21 = vpop.permute.xlu1 %33 }
 0x17a   :  { %v36_v22 = vmul.f32 %v34_v21, %v8_v1 }
 0x17b   :  { %57 = vrot.lane.b32.xlu1 %v8_v1, %s98_s11 }
 0x1e9   :  { %v44_v23 = vpop.permute.xlu1 %43  ;;  %v54_v25 = vpop.permute.xlu0 %53 }
 0x1ea   :  { %v46_v24 = vadd.f32 %v44_v23, %v36_v22 }
 0x1ec   :  { %v56_v26 = vadd.f32 %v54_v25, %v46_v24 }
 0x1ed   :  { %v58_v27 = vpop.permute.xlu1 %57 }
 0x1ee   :  { %v60_v28 = vadd.f32 %v58_v27, %v56_v26 }
 0x1f0   :  { %63 = vrot.lane.b32.xlu0 %v60_v28, %s99_s12 }
 0x262   :  { %v64_v29 = vpop.permute.xlu0 %63 }
 0x263   :  { %67 = vst.msk [vmem:[%s120_s1] sm:$0xf] %vm66_vm0, %v64_v29 }

</bundles_post_ra>
